<compile_context>
chip_gen: v6e
topology: v6e:2x2x1
jax: 0.10.0
libtpu: 0.0.40
codegen_flags: <defaults>
</compile_context>

<pallas_src>
import functools

import jax
import jax.numpy as jnp
from jax.experimental import pallas as pl
from jax.experimental.pallas import tpu as pltpu

IN_FEATURES = 10
OUT_FEATURES = 5
OUT_PAD = 8        # lane-padded output width (full last dim of the out array)
DEFAULT_TB = 4096  # batch tile: large (amortizes ~0.35us/step), v5e-VMEM safe


def linear_kernel(x_ref, w_ref, b_ref, o_ref):
    # x_ref: (TB, IN) f32
    # w_ref: (IN, OUT_PAD) f32 -- W^T, output lanes padded 5 -> 8 with zeros.
    # b_ref: (1, OUT_PAD) f32  -- bias, padded 5 -> 8 with zeros.
    # o_ref: (TB, OUT_PAD) f32
    acc = jnp.dot(
        x_ref[...],
        w_ref[...],
        preferred_element_type=jnp.float32,
        precision=jax.lax.Precision.HIGHEST,  # keep f32 accuracy for 1e-5 checks
    )
    o_ref[...] = (acc + b_ref[...]).astype(o_ref.dtype)


def _round_up(n, m):
    return ((n + m - 1) // m) * m


def _pick_tile(B, block_b):
    # 8-aligned (f32 sublanes) batch tile, never larger than needed.
    tb = min(block_b, _round_up(B, 8))
    if B >= 16:
        # Guarantee >= 2 grid steps so the "parallel" batch axis can actually
        # split across v7x's two TensorCores (no-op on v5e/v6e).
        tb = min(tb, _round_up(pl.cdiv(B, 2), 8))
    return max(8, tb)


@functools.partial(jax.jit, static_argnames=("block_b",))
def linear_pallas(x, w, b, *, block_b=DEFAULT_TB):
    """y = x @ w.T + b.  x: (B, IN) f32, w: (OUT, IN) f32, b: (OUT,) f32."""
    B = x.shape[0]
    tb = _pick_tile(B, block_b)
    grid_b = pl.cdiv(B, tb)

    # Lane-pad the parameters once on the host side of the call.
    w_pad = jnp.zeros((IN_FEATURES, OUT_PAD), dtype=x.dtype)
    w_pad = w_pad.at[:, :OUT_FEATURES].set(w.T.astype(x.dtype))
    b_pad = jnp.zeros((1, OUT_PAD), dtype=x.dtype)
    b_pad = b_pad.at[0, :OUT_FEATURES].set(b.astype(x.dtype))

    cost = pl.CostEstimate(
        flops=2 * B * IN_FEATURES * OUT_FEATURES,
        transcendentals=0,
        bytes_accessed=(B * IN_FEATURES          # x read
                        + B * OUT_PAD            # y write (8 lanes, not 128)
                        + IN_FEATURES * OUT_PAD  # weights
                        + OUT_PAD) * 4,          # bias
    )

    out_padded = pl.pallas_call(
        linear_kernel,
        out_shape=jax.ShapeDtypeStruct((B, OUT_PAD), x.dtype),
        grid=(grid_b,),
        in_specs=[
            # x: tiled over batch; last dim (10) equals the full array dim.
            pl.BlockSpec((tb, IN_FEATURES), lambda i: (i, 0)),
            # weights / bias: same tiny block every step (re-fetch elided).
            pl.BlockSpec((IN_FEATURES, OUT_PAD), lambda i: (0, 0)),
            pl.BlockSpec((1, OUT_PAD), lambda i: (0, 0)),
        ],
        out_specs=pl.BlockSpec((tb, OUT_PAD), lambda i: (i, 0)),
        compiler_params=pltpu.CompilerParams(
            dimension_semantics=("parallel",),  # batch tiles shard on v7x 2xTC
        ),
        cost_estimate=cost,
    )(x, w_pad, b_pad)

    # Kernel output is (B, 8); the real result is the first 5 columns.
    return out_padded[:, :OUT_FEATURES]


if __name__ == "__main__":
    key = jax.random.PRNGKey(0)
    k_x, k_w, k_b, k_x2 = jax.random.split(key, 4)

    # Deterministic parameter init (mimics torch.nn.Linear's uniform range).
    bound = 1.0 / (IN_FEATURES ** 0.5)
    w = jax.random.uniform(k_w, (OUT_FEATURES, IN_FEATURES),
                           minval=-bound, maxval=bound, dtype=jnp.float32)
    b = jax.random.uniform(k_b, (OUT_FEATURES,),
                           minval=-bound, maxval=bound, dtype=jnp.float32)

    # Primary small-shape check (batch=2).
    batch = 2
    x = jax.random.normal(k_x, (batch, IN_FEATURES), dtype=jnp.float32)
    out = linear_pallas(x, w, b)
    jax.block_until_ready(out)
    ref = x @ w.T + b
    assert out.shape == (batch, OUT_FEATURES)
    assert jnp.allclose(out, ref, atol=1e-5, rtol=1e-5)

    # Secondary check: multi-step grid with a ragged last batch tile.
    x2 = jax.random.normal(k_x2, (20, IN_FEATURES), dtype=jnp.float32)
    out2 = linear_pallas(x2, w, b, block_b=8)
    jax.block_until_ready(out2)
    ref2 = x2 @ w.T + b
    assert out2.shape == (20, OUT_FEATURES)
    assert jnp.allclose(out2, ref2, atol=1e-5, rtol=1e-5)

    print("KERNEL_OK")
</pallas_src>

<mosaic_0001>
module attributes {stable_mosaic.version = 11 : i64} {
  func.func @linear_kernel(%arg0: i32, %arg1: memref<8x10xf32, #tpu.memory_space<vmem>>, %arg2: memref<10x8xf32, #tpu.memory_space<vmem>>, %arg3: memref<1x8xf32, #tpu.memory_space<vmem>>, %arg4: memref<8x8xf32, #tpu.memory_space<vmem>>) attributes {dimension_semantics = [#tpu.dimension_semantics<parallel>], iteration_bounds = array<i64: 1>, scalar_prefetch = 0 : i64, scratch_operands = 0 : i64, tpu.core_type = #tpu.core_type<tc>, window_params = [{transform_indices = @transform_0, window_bounds = array<i64: 8, 10>}, {pipeline_mode = #tpu.pipeline_mode<synchronous>, transform_indices = @transform_1, window_bounds = array<i64: 10, 8>}, {pipeline_mode = #tpu.pipeline_mode<synchronous>, transform_indices = @transform_2, window_bounds = array<i64: 1, 8>}, {transform_indices = @transform_3, window_bounds = array<i64: 8, 8>}]} {
    %c0 = arith.constant 0 : index
    %c0_0 = arith.constant 0 : index
    %0 = vector.load %arg1[%c0, %c0_0] : memref<8x10xf32, #tpu.memory_space<vmem>>, vector<8x10xf32>
    %c0_1 = arith.constant 0 : index
    %c0_2 = arith.constant 0 : index
    %1 = vector.load %arg2[%c0_1, %c0_2] : memref<10x8xf32, #tpu.memory_space<vmem>>, vector<10x8xf32>
    %cst = arith.constant dense<0.000000e+00> : vector<8x8xf32>
    %2 = tpu.matmul %0, %1, %cst {dimension_numbers = #tpu.dot_dimension_numbers<[1], [0], [0], [1], [0, 0, 1, 1], [], []>, precision = #tpu.contract_precision<fp32>} : vector<8x10xf32>, vector<10x8xf32>, vector<8x8xf32> -> vector<8x8xf32>
    %c0_3 = arith.constant 0 : index
    %c0_4 = arith.constant 0 : index
    %3 = vector.load %arg3[%c0_3, %c0_4] : memref<1x8xf32, #tpu.memory_space<vmem>>, vector<1x8xf32>
    %4 = vector.broadcast %3 : vector<1x8xf32> to vector<8x8xf32>
    %5 = arith.addf %2, %4 : vector<8x8xf32>
    %c0_5 = arith.constant 0 : index
    %c0_6 = arith.constant 0 : index
    %6 = vector.load %arg4[%c0_5, %c0_6] : memref<8x8xf32, #tpu.memory_space<vmem>>, vector<8x8xf32>
    tpu.vector_store %arg4[%c0_5, %c0_6], %5 {strides = array<i32>} : memref<8x8xf32, #tpu.memory_space<vmem>>, vector<8x8xf32>,
    return
  }
  func.func @transform_0(%arg0: i32) -> (i32, i32) {
    %c0_i32 = arith.constant 0 : i32
    %c0_i32_0 = arith.constant 0 : i32
    return %arg0, %c0_i32 : i32, i32
  }
  func.func @transform_1(%arg0: i32) -> (i32, i32) {
    %c0_i32 = arith.constant 0 : i32
    %c0_i32_0 = arith.constant 0 : i32
    %c0_i32_1 = arith.constant 0 : i32
    return %c0_i32, %c0_i32_0 : i32, i32
  }
  func.func @transform_2(%arg0: i32) -> (i32, i32) {
    %c0_i32 = arith.constant 0 : i32
    %c0_i32_0 = arith.constant 0 : i32
    %c0_i32_1 = arith.constant 0 : i32
    return %c0_i32, %c0_i32_0 : i32, i32
  }
  func.func @transform_3(%arg0: i32) -> (i32, i32) {
    %c0_i32 = arith.constant 0 : i32
    %c0_i32_0 = arith.constant 0 : i32
    return %arg0, %c0_i32 : i32, i32
  }
}

</mosaic_0001>

<bundles_post_ra>
// kernel: linear_pallas.1
= control target key start
LH: loop header
LB: loop body
LE: loop exit
PB: predicated region body
PF: predicated region fallthrough
CT: control target
= control target key end

     0   :  { %8 = vsyncpa [#allocation3], 0  ;;  %vm29_vm0 = vcmask 1041408   ;;  %v598_v1 = vmov 0.0   ;;  %vm25_vm1 = vcmask 80896   ;;  %vm599_vm2 = vmmov 0   ;;  %s644_s0 = inlined_call_operand.vmem [shape: f32[2,10], index: 0, kind: input, shape index: {}]   ;;  %s645_s1 = inlined_call_operand.vmem [shape: f32[10,8], index: 1, kind: input, shape index: {}]   ;;  %s646_s2 = inlined_call_operand.vmem [shape: f32[1,8], index: 2, kind: input, shape index: {}]   ;;  %s647_s3 = inlined_call_operand.hbm [shape: f32[2,8], index: 3, kind: output, shape index: {}]  }
   0x1   :  { %v17_v0 = vld [vmem:[%s645_s1 + $0x8] sm:$0x3]  ;;  %529 = vmatprep.subr.mxu0 %v598_v1  ;;  %v16_v3 = vld [vmem:[%s645_s1] sm:$0xff]  ;;  %536 = vmatprep.subr.mxu1 %v598_v1  ;;  %vm492_vm3 = vcmask 64512  }
   0x2   :  { %v31_v2 = vsel %vm29_vm0, %v17_v0, 0  ;;  %v15_v4 = vld [vmem:[%s644_s0] sm:$0xff]  ;;  %v65_v6 = vand.u32 4294901760, %v16_v3  ;;  %533 = vmatprep.mubr.msk.f32.mxu0 %vm599_vm2, %v598_v1  ;;  %540 = vmatprep.mubr.msk.f32.mxu1 %vm599_vm2, %v598_v1 }
   0x3   :  { %v62_v5 = vand.u32 4294901760, %v31_v2  ;;  %v27_v7 = vsel %vm25_vm1, %v15_v4, 0  ;;  %v510_v21 = vld [vmem:[%s646_s2] ss:$0 sm:$0xff] }
   0x4   :  { %v100_v8 = vand.u32 4294901760, %v27_v7  ;;  %v147_v10 = vsub.f32 %v16_v3, %v65_v6 }
   0x5   :  { %530 = vmatpush3.msra.mxu0 %v62_v5  ;;  %v140_v9 = vsub.f32 %v31_v2, %v62_v5 }
   0x6   :  { %531 = vmatprep.subr.mxu0 %v598_v1  ;;  %v101_v11 = vsub.f32 %v27_v7, %v100_v8  ;;  %v148_v13 = vand.u32 4294901760, %v147_v10 }
   0x7   :  { %532 = vmatpush3.msra.mxu0 %v65_v6  ;;  %v141_v12 = vand.u32 4294901760, %v140_v9 }
   0x8   :  { %v102_v14 = vand.u32 4294901760, %v101_v11  ;;  %543 = vmatprep.subr.mxu0 %v598_v1  ;;  %v149_v16 = vsub.f32 %v147_v10, %v148_v13 }
   0x9   :  { %v142_v15 = vsub.f32 %v140_v9, %v141_v12 }
   0xa   :  { %v103_v17 = vsub.f32 %v101_v11, %v102_v14  ;;  %v150_v19 = vand.u32 4294901760, %v149_v16 }
   0xb   :  { %v143_v18 = vand.u32 4294901760, %v142_v15 }
   0xc   :  { %v104_v20 = vand.u32 4294901760, %v103_v17 }
   0xd   :  { %537 = vmatpush3.msra.mxu1 %v143_v18 }
   0xe   :  { %534 = vmatmul.mubr.f32.vlgmr.msra.gmra.mxu0 %v104_v20  ;;  %538 = vmatprep.subr.mxu1 %v598_v1 }
   0xf   :  { %544 = vmatpush3.msra.mxu0 %v140_v9  ;;  %539 = vmatpush3.msra.mxu1 %v150_v19 }
  0x10   :  { %545 = vmatprep.subr.mxu0 %v598_v1  ;;  %541 = vmatmul.mubr.f32.vlgmr.msra.gmra.mxu1 %v100_v8 }
  0x11   :  { %546 = vmatpush3.msra.mxu0 %v147_v10  ;;  %547 = vmatprep.mubr.msk.f32.mxu0 %vm599_vm2, %v598_v1 }
  0x12   :  { %550 = vmatprep.subr.mxu1 %v598_v1  ;;  %548 = vmatmul.mubr.f32.vlgmr.msra.gmra.mxu0 %v101_v11 }
  0x13   :  { %551 = vmatpush3.msra.mxu1 %v62_v5  ;;  %557 = vmatprep.subr.mxu0 %v598_v1 }
  0x14   :  { %552 = vmatprep.subr.mxu1 %v598_v1  ;;  %558 = vmatpush3.msra.mxu0 %v141_v12 }
  0x15   :  { %553 = vmatpush3.msra.mxu1 %v65_v6  ;;  %554 = vmatprep.mubr.msk.f32.mxu1 %vm599_vm2, %v598_v1 }
  0x16   :  { %559 = vmatprep.subr.mxu0 %v598_v1  ;;  %555 = vmatmul.mubr.f32.vlgmr.msra.gmra.mxu1 %v102_v14 }
  0x17   :  { %560 = vmatpush3.msra.mxu0 %v148_v13  ;;  %561 = vmatprep.mubr.msk.f32.mxu0 %vm599_vm2, %v598_v1 }
  0x18   :  { %564 = vmatprep.subr.mxu1 %v598_v1  ;;  %562 = vmatmul.mubr.f32.vlgmr.msra.gmra.mxu0 %v100_v8 }
  0x19   :  { %565 = vmatpush3.msra.mxu1 %v62_v5  ;;  %568 = vmatprep.mubr.msk.f32.mxu1 %vm599_vm2, %v598_v1 }
  0x1a   :  { %566 = vmatprep.subr.mxu1 %v598_v1 }
  0x1b   :  { %567 = vmatpush3.msra.mxu1 %v65_v6 }
  0x1c   :  { %569 = vmatmul.mubr.f32.vlgmr.msra.gmra.mxu1 %v100_v8 }
  0xce   :  { %v106_v22 = vpop.f32.mrf.mxu0 }
  0xcf   :  { %v107_v23 = vadd.f32 %v510_v21, %v106_v22 }
  0xd0   :  { %v535_v24 = vpop.f32.mrf.mxu0  ;;  %v187_v25 = vpop.f32.mrf.mxu1 }
  0xd1   :  { %v188_v26 = vadd.f32 %v187_v25, %v107_v23 }
  0xd2   :  { %v263_v27 = vpop.f32.mrf.mxu0  ;;  %v542_v28 = vpop.f32.mrf.mxu1 }
  0xd3   :  { %v264_v29 = vadd.f32 %v263_v27, %v188_v26 }
  0xd4   :  { %v549_v30 = vpop.f32.mrf.mxu0 }
  0xd6   :  { %v338_v31 = vpop.f32.mrf.mxu1 }
  0xd7   :  { %v339_v32 = vadd.f32 %v338_v31, %v264_v29 }
  0xd8   :  { %v415_v33 = vpop.f32.mrf.mxu0  ;;  %v556_v34 = vpop.f32.mrf.mxu1 }
  0xd9   :  { %v416_v35 = vadd.f32 %v415_v33, %v339_v32 }
  0xda   :  { %v563_v36 = vpop.f32.mrf.mxu0 }
  0xdc   :  { %v488_v37 = vpop.f32.mrf.mxu1 }
  0xdd   :  { %v489_v38 = vadd.f32 %v488_v37, %v416_v35 }
  0xde   :  { %v570_v39 = vpop.f32.mrf.mxu1 }
  0xdf   :  { %493 = vst.msk [vmem:[#allocation2] sm:$0xff] %vm492_vm3, %v489_v38 }
  0xe0   :  { %498 = vsyncadd [#allocation3], 96  ;;  %s600_s2 = smov [#allocation2]  }
  0xe1   :  { %s499_s18 = sshll.u32 %s600_s2, 4  ;;  %s500_s18 = int_to_ptr.vmem [resolvable:$true] %s499_s18 }
  0xe2   :  { %s576_s19 = scalar_lea.vmem %s500_s18, 32  ;;  %s580_s20 = scalar_lea.vmem %s500_s18, 128 }
  0xe3   :  { %p577_p0 = scmp.ne.s32.totalorder %s500_s18, %s576_s19  ;;  %p581_p1 = scmp.lt.s32.totalorder %s500_s18, %s500_s18 }
  0xe4   :  { %p582_p2 = scmp.lt.s32.totalorder %s580_s20, %s576_s19 }
  0xe6   :  { %p583_p3 = por %p582_p2, %p581_p1 }
  0xe8   :  { %p584_p4 = pnand %p583_p3, %p577_p0 }
  0xea   :  { %587 = shalt.err (!%p584_p4)
}
  0xeb   :  { %s601_s21 = smov 32   ;;  %s602_s22 = smov 2  }
  0xec   :  { %505 = dma.vmem_to_hbm [thread:$0]  %s500_s18, 32, %s647_s3, [#allocation3], %s601_s21, %s601_s21, %s602_s22  }
  0xed   :  { %596 = dma.done.wait [#allocation3], 128  }
  0xee   :  { %597 = vsyncadd [#allocation3], 4294967168 }
  0xef   :  { %509 = vsyncpa [#allocation3], 1 }

</bundles_post_ra>
